<compile_context>
chip_gen: v7x
topology: tpu7x:2x2x1
jax: 0.10.0
libtpu: 0.0.40
codegen_flags: <defaults>
</compile_context>

<pallas_src>
import functools
import math

import jax
import jax.numpy as jnp
from jax.experimental import pallas as pl
from jax.experimental.pallas import tpu as pltpu


def _round_up(x, m):
    return ((x + m - 1) // m) * m


def _pick_tile(dim, max_tile, align):
    """Full (aligned) dim if it fits in one tile, else the capped max tile."""
    aligned = _round_up(dim, align)
    return aligned if aligned <= max_tile else max_tile


def _default_tiles():
    """Generation-aware tile defaults (128-multiples; smaller on v5e)."""
    try:
        kind = jax.devices()[0].device_kind.lower()
    except Exception:
        kind = ""
    if "v5 lite" in kind or "v5e" in kind or "v5litepod" in kind:
        return 256, 256, 256      # v5e: 4x128^2 MXU saturates with 128/256 tiles
    return 256, 512, 512          # v6e / v7x: ~7 MiB VMEM incl. double buffering


def _multi_omics_kernel(x_ref, wt_ref, adj_ref, b_ref, o_ref, acc_ref,
                        *, compute_dtype):
    """Grid = (M//tm, N//tn, K//tk); K (reduction) is the innermost axis."""
    k = pl.program_id(2)

    @pl.when(k == 0)
    def _():
        acc_ref[...] = jnp.zeros_like(acc_ref)

    # Elementwise gate of the weight tile by the adjacency tile (VPU), downcast
    # once to the MXU compute dtype, then the matmul hot path on the MXU with
    # f32 accumulation.
    w_eff = (wt_ref[...] * adj_ref[...]).astype(compute_dtype)      # (tk, tn)
    x_tile = x_ref[...].astype(compute_dtype)                       # (tm, tk)
    acc_ref[...] += jnp.dot(x_tile, w_eff,
                            preferred_element_type=jnp.float32)     # (tm, tn)

    # Bias add + store exactly once, after the last K step.
    @pl.when(k == pl.num_programs(2) - 1)
    def _():
        o_ref[...] = (acc_ref[...]
                      + b_ref[...].astype(jnp.float32)).astype(o_ref.dtype)


def multi_omics_layer(x, weight_t, adj_matrix, bias, *,
                      compute_dtype=None, tm=None, tn=None, tk=None):
    """out = x @ (weight_t * adj_matrix) + bias  (== PyTorch x @ (W.T*adj)+b).

    x:        (B, in_dims)
    weight_t: (in_dims, out_dims)  -- the PyTorch (out_dims, in_dims) weight,
                                      pre-transposed ONCE at parameter-load
                                      time (no per-call HBM transpose).
    adj:      (in_dims, out_dims)
    bias:     (out_dims,)
    compute_dtype: MXU input dtype (e.g. jnp.bfloat16 on v6e/v7x).  The gate
                   and accumulation stay in f32; defaults to x.dtype.
    """
    M, K = x.shape
    K2, N = weight_t.shape
    assert K == K2 and adj_matrix.shape == (K, N) and bias.shape == (N,)
    if compute_dtype is None:
        compute_dtype = x.dtype

    d_tm, d_tn, d_tk = _default_tiles()
    tm = tm or _pick_tile(M, d_tm, 8)
    tn = tn or _pick_tile(N, d_tn, 128)   # lane-dense output stores
    tk = tk or _pick_tile(K, d_tk, 128)

    # Zero-pad to tile multiples (zeros do not change the result; padded rows /
    # cols of the output are sliced off below).
    Mp, Np, Kp = _round_up(M, tm), _round_up(N, tn), _round_up(K, tk)
    if (Mp, Kp) != (M, K):
        x = jnp.pad(x, ((0, Mp - M), (0, Kp - K)))
    if (Kp, Np) != (K, N):
        weight_t = jnp.pad(weight_t, ((0, Kp - K), (0, Np - N)))
        adj_matrix = jnp.pad(adj_matrix, ((0, Kp - K), (0, Np - N)))
    if Np != N:
        bias = jnp.pad(bias, (0, Np - N))
    b2d = bias.reshape(1, Np)

    gm, gn, gk = Mp // tm, Np // tn, Kp // tk
    itemsize = jnp.dtype(x.dtype).itemsize

    # Double-buffered input tiles + double-buffered output tile + f32 acc.
    vmem_need = (2 * (tm * tk + 2 * tk * tn + tn) * itemsize
                 + 2 * tm * tn * itemsize + tm * tn * 4)
    vmem_limit = int(min(max(vmem_need + (4 << 20), 16 << 20), 48 << 20))

    cost = pl.CostEstimate(
        flops=2 * M * N * K + M * N,
        transcendentals=0,
        bytes_accessed=(x.nbytes + weight_t.nbytes + adj_matrix.nbytes
                        + bias.nbytes + M * N * itemsize),
    )

    kernel = functools.partial(_multi_omics_kernel, compute_dtype=compute_dtype)

    out = pl.pallas_call(
        kernel,
        out_shape=jax.ShapeDtypeStruct((Mp, Np), x.dtype),
        grid_spec=pltpu.PrefetchScalarGridSpec(
            num_scalar_prefetch=0,
            grid=(gm, gn, gk),                                    # K innermost
            in_specs=[
                pl.BlockSpec((tm, tk), lambda i, j, k: (i, k)),   # x
                pl.BlockSpec((tk, tn), lambda i, j, k: (k, j)),   # weight_t
                pl.BlockSpec((tk, tn), lambda i, j, k: (k, j)),   # adj
                pl.BlockSpec((1, tn), lambda i, j, k: (0, j)),    # bias
            ],
            out_specs=pl.BlockSpec((tm, tn), lambda i, j, k: (i, j)),
            scratch_shapes=[pltpu.VMEM((tm, tn), jnp.float32)],
        ),
        compiler_params=pltpu.CompilerParams(
            dimension_semantics=("parallel", "parallel", "arbitrary"),
            vmem_limit_bytes=vmem_limit,
        ),
        cost_estimate=cost,
    )(x, weight_t, adj_matrix, b2d)

    if (Mp, Np) != (M, N):
        out = out[:M, :N]
    return out


def init_params(key, in_dims, out_dims):
    """Deterministic re-implementation of the PyTorch init (kaiming_uniform_
    with a=sqrt(5); bias uniform in +-1/sqrt(fan_in))."""
    kw, kb = jax.random.split(key)
    fan_in = in_dims
    gain = math.sqrt(2.0 / (1.0 + 5.0))                 # a = sqrt(5)
    w_bound = gain * math.sqrt(3.0 / fan_in)            # = sqrt(1/fan_in)
    weight = jax.random.uniform(kw, (out_dims, in_dims),
                                minval=-w_bound, maxval=w_bound,
                                dtype=jnp.float32)
    b_bound = 1.0 / math.sqrt(fan_in)
    bias = jax.random.uniform(kb, (out_dims,),
                              minval=-b_bound, maxval=b_bound,
                              dtype=jnp.float32)
    return weight, bias


if __name__ == "__main__":
    key = jax.random.PRNGKey(0)
    k_x, k_adj, k_p = jax.random.split(key, 3)

    B, in_dims, out_dims = 8, 16, 32

    x = jax.random.normal(k_x, (B, in_dims), dtype=jnp.float32)
    # Adjacency matrix (e.g. binary gene-protein regulatory mask), broadcast-
    # compatible with weight.T -> shape (in_dims, out_dims).
    adj = (jax.random.uniform(k_adj, (in_dims, out_dims)) > 0.5).astype(jnp.float32)
    weight, bias = init_params(k_p, in_dims, out_dims)

    # One-time repack at "parameter load" time (NOT per forward call).
    weight_t = jnp.asarray(weight.T)                    # (in_dims, out_dims)

    # Pure-JAX reference of the exact PyTorch semantics.
    ref = x @ (weight.T * adj) + bias

    # f32 MXU path (strict check).
    out = jax.block_until_ready(multi_omics_layer(x, weight_t, adj, bias))
    assert out.shape == (B, out_dims)
    assert jnp.allclose(out, ref, atol=1e-5, rtol=1e-5)

    # bf16 MXU fast path (v6e/v7x): bf16 inputs to the MXU, f32 accumulation.
    out_bf16 = jax.block_until_ready(
        multi_omics_layer(x, weight_t, adj, bias, compute_dtype=jnp.bfloat16))
    assert out_bf16.shape == (B, out_dims)
    assert jnp.allclose(out_bf16, ref, atol=2e-2, rtol=2e-2)

    print("KERNEL_OK")
</pallas_src>

<mosaic_0001>
module attributes {stable_mosaic.version = 11 : i64} {
  func.func @_multi_omics_kernel(%arg0: i32, %arg1: i32, %arg2: i32, %arg3: memref<8x128xf32, #tpu.memory_space<vmem>>, %arg4: memref<128x128xf32, #tpu.memory_space<vmem>>, %arg5: memref<128x128xf32, #tpu.memory_space<vmem>>, %arg6: memref<1x128xf32, #tpu.memory_space<vmem>>, %arg7: memref<8x128xf32, #tpu.memory_space<vmem>>, %arg8: memref<8x128xf32, #tpu.memory_space<vmem>>) attributes {dimension_semantics = [#tpu.dimension_semantics<parallel>, #tpu.dimension_semantics<parallel>, #tpu.dimension_semantics<arbitrary>], iteration_bounds = array<i64: 1, 1, 1>, scalar_prefetch = 0 : i64, scratch_operands = 1 : i64, tpu.core_type = #tpu.core_type<tc>, window_params = [{transform_indices = @transform_0, window_bounds = array<i64: 8, 128>}, {transform_indices = @transform_1, window_bounds = array<i64: 128, 128>}, {transform_indices = @transform_2, window_bounds = array<i64: 128, 128>}, {transform_indices = @transform_3, window_bounds = array<i64: 1, 128>}, {transform_indices = @transform_4, window_bounds = array<i64: 8, 128>}]} {
    %c0_i32 = arith.constant 0 : i32
    %0 = arith.cmpi eq, %arg2, %c0_i32 : i32
    %1 = arith.extui %0 : i1 to i32
    %c0_i32_0 = arith.constant 0 : i32
    %2 = arith.cmpi ne, %1, %c0_i32_0 : i32
    scf.if %2 {
      %cst_12 = arith.constant 0.000000e+00 : f32
      %14 = vector.broadcast %cst_12 : f32 to vector<8x128xf32>
      %c0_13 = arith.constant 0 : index
      %c0_14 = arith.constant 0 : index
      %15 = vector.load %arg8[%c0_13, %c0_14] : memref<8x128xf32, #tpu.memory_space<vmem>>, vector<8x128xf32>
      tpu.vector_store %arg8[%c0_13, %c0_14], %14 {strides = array<i32>} : memref<8x128xf32, #tpu.memory_space<vmem>>, vector<8x128xf32>,
    } else {
    }
    %c0 = arith.constant 0 : index
    %c0_1 = arith.constant 0 : index
    %3 = vector.load %arg4[%c0, %c0_1] : memref<128x128xf32, #tpu.memory_space<vmem>>, vector<128x128xf32>
    %c0_2 = arith.constant 0 : index
    %c0_3 = arith.constant 0 : index
    %4 = vector.load %arg5[%c0_2, %c0_3] : memref<128x128xf32, #tpu.memory_space<vmem>>, vector<128x128xf32>
    %5 = arith.mulf %3, %4 : vector<128x128xf32>
    %c0_4 = arith.constant 0 : index
    %c0_5 = arith.constant 0 : index
    %6 = vector.load %arg3[%c0_4, %c0_5] : memref<8x128xf32, #tpu.memory_space<vmem>>, vector<8x128xf32>
    %c0_6 = arith.constant 0 : index
    %c0_7 = arith.constant 0 : index
    %7 = vector.load %arg8[%c0_6, %c0_7] : memref<8x128xf32, #tpu.memory_space<vmem>>, vector<8x128xf32>
    %cst = arith.constant dense<0.000000e+00> : vector<8x128xf32>
    %8 = tpu.matmul %6, %5, %cst {dimension_numbers = #tpu.dot_dimension_numbers<[1], [0], [0], [1], [0, 0, 1, 1], [], []>} : vector<8x128xf32>, vector<128x128xf32>, vector<8x128xf32> -> vector<8x128xf32>
    %9 = arith.addf %7, %8 : vector<8x128xf32>
    %c0_8 = arith.constant 0 : index
    %c0_9 = arith.constant 0 : index
    %10 = vector.load %arg8[%c0_8, %c0_9] : memref<8x128xf32, #tpu.memory_space<vmem>>, vector<8x128xf32>
    tpu.vector_store %arg8[%c0_8, %c0_9], %9 {strides = array<i32>} : memref<8x128xf32, #tpu.memory_space<vmem>>, vector<8x128xf32>,
    %c0_i32_10 = arith.constant 0 : i32
    %11 = arith.cmpi eq, %arg2, %c0_i32_10 : i32
    %12 = arith.extui %11 : i1 to i32
    %c0_i32_11 = arith.constant 0 : i32
    %13 = arith.cmpi ne, %12, %c0_i32_11 : i32
    scf.if %13 {
      %c0_12 = arith.constant 0 : index
      %c0_13 = arith.constant 0 : index
      %14 = vector.load %arg8[%c0_12, %c0_13] : memref<8x128xf32, #tpu.memory_space<vmem>>, vector<8x128xf32>
      %c0_14 = arith.constant 0 : index
      %c0_15 = arith.constant 0 : index
      %15 = vector.load %arg6[%c0_14, %c0_15] : memref<1x128xf32, #tpu.memory_space<vmem>>, vector<1x128xf32>
      %16 = vector.broadcast %15 : vector<1x128xf32> to vector<8x128xf32>
      %17 = arith.addf %14, %16 : vector<8x128xf32>
      %c0_16 = arith.constant 0 : index
      %c0_17 = arith.constant 0 : index
      %18 = vector.load %arg7[%c0_16, %c0_17] : memref<8x128xf32, #tpu.memory_space<vmem>>, vector<8x128xf32>
      tpu.vector_store %arg7[%c0_16, %c0_17], %17 {strides = array<i32>} : memref<8x128xf32, #tpu.memory_space<vmem>>, vector<8x128xf32>,
    } else {
    }
    return
  }
  func.func @transform_0(%arg0: i32, %arg1: i32, %arg2: i32) -> (i32, i32) {
    %c0_i32 = arith.constant 0 : i32
    return %arg0, %arg2 : i32, i32
  }
  func.func @transform_1(%arg0: i32, %arg1: i32, %arg2: i32) -> (i32, i32) {
    %c0_i32 = arith.constant 0 : i32
    return %arg2, %arg1 : i32, i32
  }
  func.func @transform_2(%arg0: i32, %arg1: i32, %arg2: i32) -> (i32, i32) {
    %c0_i32 = arith.constant 0 : i32
    return %arg2, %arg1 : i32, i32
  }
  func.func @transform_3(%arg0: i32, %arg1: i32, %arg2: i32) -> (i32, i32) {
    %c0_i32 = arith.constant 0 : i32
    %c0_i32_0 = arith.constant 0 : i32
    return %c0_i32, %arg1 : i32, i32
  }
  func.func @transform_4(%arg0: i32, %arg1: i32, %arg2: i32) -> (i32, i32) {
    %c0_i32 = arith.constant 0 : i32
    return %arg0, %arg1 : i32, i32
  }
}

</mosaic_0001>

<bundles_post_ra>
// kernel: tpu_custom_call.1
= control target key start
LH: loop header
LB: loop body
LE: loop exit
PB: predicated region body
PF: predicated region fallthrough
CT: control target
= control target key end

     0   :  { %9 = vsyncpa [#allocation4], 0  ;;  %s492_s0 = inlined_call_operand.hbm [shape: f32[8,128], index: 0, kind: input, shape index: {}]   ;;  %s493_s1 = inlined_call_operand.hbm [shape: f32[128,128], index: 1, kind: input, shape index: {}]   ;;  %s494_s2 = inlined_call_operand.hbm [shape: f32[128,128], index: 2, kind: input, shape index: {}]   ;;  %s495_s3 = inlined_call_operand.vmem [shape: f32[1,128], index: 3, kind: input, shape index: {}]   ;;  %s496_s4 = inlined_call_operand.hbm [shape: f32[8,128], index: 4, kind: output, shape index: {}]  }
   0x1   :  { %10 = vsyncpa [#allocation7], 0 }
   0x2   :  { %11 = vsyncpa [#allocation5], 0  ;;  %s393_s15 = smov [#allocation6]   ;;  %s299_s19 = scalar_lea.hbm %s493_s1, 2048 }
   0x3   :  { %s27_s16 = sshll.u32 %s393_s15, 4  ;;  %p300_p0 = scmp.ne.s32.totalorder %s493_s1, %s299_s19  ;;  %s28_s16 = int_to_ptr.vmem [resolvable:$true] %s27_s16 }
   0x4   :  { %p303_p1 = scmp.lt.u32.totalorder %s299_s19, %s493_s1 }
   0x6   :  { %p305_p2 = pnand %p303_p1, %p300_p0 }
   0x8   :  { %308 = shalt.err (!%p305_p2)
}
   0x9   :  { %s309_s24 = scalar_lea.vmem %s28_s16, 2048  ;;  %p314_p4 = scmp.lt.s32.totalorder %s28_s16, %s28_s16 }
   0xa   :  { %p310_p3 = scmp.ne.s32.totalorder %s28_s16, %s309_s24  ;;  %p315_p5 = scmp.lt.s32.totalorder %s309_s24, %s309_s24 }
   0xc   :  { %p316_p6 = por %p315_p5, %p314_p4 }
   0xe   :  { %p317_p7 = pnand %p316_p6, %p310_p3 }
  0x10   :  { %320 = shalt.err (!%p317_p7)
}
  0x11   :  { %s394_s25 = smov 128   ;;  %s395_s26 = smov 8  }
  0x12   :  { %33 = dma.hbm_to_vmem [thread:$0]  %s493_s1, 2048, %s28_s16, [#allocation7], %s394_s25, %s394_s25, %s395_s26  }
  0x13   :  { %s396_s29 = smov [#allocation3]   ;;  %s397_s5 = smov [#allocation8]  }
  0x14   :  { %s18_s30 = sshll.u32 %s396_s29, 4  ;;  %s39_s6 = sshll.u32 %s397_s5, 4  ;;  %s19_s30 = int_to_ptr.vmem [resolvable:$true] %s18_s30  ;;  %s40_s6 = int_to_ptr.vmem [resolvable:$true] %s39_s6 }
  0x15   :  { %s321_s9 = scalar_lea.hbm %s492_s0, 128 }
  0x16   :  { %p322_p8 = scmp.ne.s32.totalorder %s492_s0, %s321_s9  ;;  %p325_p9 = scmp.lt.u32.totalorder %s321_s9, %s492_s0 }
  0x18   :  { %p327_p10 = pnand %p325_p9, %p322_p8 }
  0x1a   :  { %330 = shalt.err (!%p327_p10)
}
  0x1b   :  { %s331_s1 = scalar_lea.vmem %s19_s30, 128  ;;  %p336_p12 = scmp.lt.s32.totalorder %s19_s30, %s19_s30 }
  0x1c   :  { %p332_p11 = scmp.ne.s32.totalorder %s19_s30, %s331_s1  ;;  %p337_p13 = scmp.lt.s32.totalorder %s331_s1, %s331_s1 }
  0x1e   :  { %p338_p0 = por %p337_p13, %p336_p12 }
  0x20   :  { %p339_p1 = pnand %p338_p0, %p332_p11 }
  0x22   :  { %342 = shalt.err (!%p339_p1)
}
  0x23   :  { %21 = dma.hbm_to_vmem [thread:$0]  %s492_s0, 128, %s19_s30, [#allocation4]  }
  0x24   :  { %s343_s18 = scalar_lea.hbm %s494_s2, 2048 }
  0x25   :  { %p344_p2 = scmp.ne.s32.totalorder %s494_s2, %s343_s18  ;;  %p347_p3 = scmp.lt.u32.totalorder %s343_s18, %s494_s2 }
  0x27   :  { %p349_p4 = pnand %p347_p3, %p344_p2 }
  0x29   :  { %352 = shalt.err (!%p349_p4)
}
  0x2a   :  { %s353_s23 = scalar_lea.vmem %s40_s6, 2048  ;;  %p358_p6 = scmp.lt.s32.totalorder %s40_s6, %s40_s6 }
  0x2b   :  { %p354_p5 = scmp.ne.s32.totalorder %s40_s6, %s353_s23  ;;  %p359_p7 = scmp.lt.s32.totalorder %s353_s23, %s353_s23 }
  0x2d   :  { %p360_p8 = por %p359_p7, %p358_p6 }
  0x2f   :  { %p361_p9 = pnand %p360_p8, %p354_p5 }
  0x31   :  { %364 = shalt.err (!%p361_p9)
}
  0x32   :  { %45 = dma.hbm_to_vmem [thread:$0]  %s494_s2, 2048, %s40_s6, [#allocation7], %s394_s25, %s394_s25, %s395_s26  }
  0x33   :  { %387 = dma.done.wait [#allocation4], 128  }
  0x34   :  { %388 = vsyncadd [#allocation4], 4294967168 }
  0x35   :  { %389 = dma.done.wait [#allocation7], 4096  }
  0x36   :  { %390 = vsyncadd [#allocation7], 4294963200  ;;  %v398_v0 = vmov 0.0|0.0   ;;  %vm399_vm0 = vmmov 0   ;;  %v400_v1 = vmov 0.0   ;;  %v62_v2 = vld [vmem:[#allocation6] sm:$0xff] }
  0x37   :  { %266 = vmatprep.subr.bf16.mxu0 %v398_v0  ;;  %263 = vmatprep.mubr.msk.f32.mxu0 %vm399_vm0, %v400_v1  ;;  %v63_v3 = vld [vmem:[#allocation6 + $0x8] sm:$0xff]  ;;  %v78_v4 = vld [vmem:[#allocation8] sm:$0xff]  ;;  %v64_v7 = vld [vmem:[#allocation6 + $0x10] sm:$0xff]  ;;  %s401_s26 = smov [#allocation9]  }
  0x38   :  { %v79_v5 = vld [vmem:[#allocation8 + $0x8] sm:$0xff]  ;;  %v94_v6 = vmul.f32 %v78_v4, %v62_v2  ;;  %v65_v8 = vld [vmem:[#allocation6 + $0x18] sm:$0xff]  ;;  %v80_v10 = vld [vmem:[#allocation8 + $0x10] sm:$0xff]  ;;  %s203_s27 = sshll.u32 %s401_s26, 4  ;;  %s204_s27 = int_to_ptr.vmem [resolvable:$true] %s203_s27 }
  0x39   :  { %v95_v9 = vmul.f32 %v79_v5, %v63_v3  ;;  %v81_v11 = vld [vmem:[#allocation8 + $0x18] sm:$0xff]  ;;  %v66_v12 = vld [vmem:[#allocation6 + $0x20] sm:$0xff]  ;;  %v96_v13 = vmul.f32 %v80_v10, %v64_v7  ;;  %v67_v15 = vld [vmem:[#allocation6 + $0x28] sm:$0xff]  ;;  %s365_s28 = scalar_lea.vmem %s204_s27, 128  ;;  %p370_p11 = scmp.lt.s32.totalorder %s204_s27, %s204_s27 }
  0x3a   :  { %v97_v14 = vmul.f32 %v81_v11, %v65_v8  ;;  %v82_v16 = vld [vmem:[#allocation8 + $0x20] sm:$0xff]  ;;  %v83_v17 = vld [vmem:[#allocation8 + $0x28] sm:$0xff]  ;;  %v68_v22 = vld [vmem:[#allocation6 + $0x30] sm:$0xff]  ;;  %p366_p10 = scmp.ne.s32.totalorder %s204_s27, %s365_s28  ;;  %p371_p12 = scmp.lt.s32.totalorder %s365_s28, %s365_s28 }
  0x3b   :  { %v267_v18 = vpack.c.bf16 %v95_v9, %v94_v6  ;;  %v98_v20 = vmul.f32 %v82_v16, %v66_v12  ;;  %v99_v21 = vmul.f32 %v83_v17, %v67_v15  ;;  %v69_v23 = vld [vmem:[#allocation6 + $0x38] sm:$0xff]  ;;  %v84_v24 = vld [vmem:[#allocation8 + $0x30] sm:$0xff]  ;;  %v70_v29 = vld [vmem:[#allocation6 + $0x40] sm:$0xff] }
  0x3c   :  { %v270_v19 = vpack.c.bf16 %v97_v14, %v96_v13  ;;  %v85_v25 = vld [vmem:[#allocation8 + $0x38] sm:$0xff]  ;;  %v100_v27 = vmul.f32 %v84_v24, %v68_v22  ;;  %v71_v30 = vld [vmem:[#allocation6 + $0x48] sm:$0xff]  ;;  %v86_v31 = vld [vmem:[#allocation8 + $0x40] sm:$0xff]  ;;  %p372_p13 = por %p371_p12, %p370_p11 }
  0x3d   :  { %268 = vmatpush3.bf16.msra.mxu0 %v267_v18  ;;  %v273_v26 = vpack.c.bf16 %v99_v21, %v98_v20  ;;  %v101_v28 = vmul.f32 %v85_v25, %v69_v23  ;;  %v87_v32 = vld [vmem:[#allocation8 + $0x48] sm:$0xff]  ;;  %v102_v34 = vmul.f32 %v86_v31, %v70_v29  ;;  %v72_v36 = vld [vmem:[#allocation6 + $0x50] sm:$0xff]  ;;  %v73_v37 = vld [vmem:[#allocation6 + $0x58] sm:$0xff] }
  0x3e   :  { %269 = vmatprep.subr.bf16.mxu0 %v398_v0  ;;  %v103_v35 = vmul.f32 %v87_v32, %v71_v30  ;;  %v88_v38 = vld [vmem:[#allocation8 + $0x50] sm:$0xff]  ;;  %v89_v39 = vld [vmem:[#allocation8 + $0x58] sm:$0xff]  ;;  %v74_v43 = vld [vmem:[#allocation6 + $0x60] sm:$0xff]  ;;  %p373_p0 = pnand %p372_p13, %p366_p10 }
  0x3f   :  { %v276_v33 = vpack.c.bf16 %v101_v28, %v100_v27  ;;  %v104_v41 = vmul.f32 %v88_v38, %v72_v36  ;;  %v105_v42 = vmul.f32 %v89_v39, %v73_v37  ;;  %v75_v44 = vld [vmem:[#allocation6 + $0x68] sm:$0xff]  ;;  %v90_v45 = vld [vmem:[#allocation8 + $0x60] sm:$0xff]  ;;  %v76_v50 = vld [vmem:[#allocation6 + $0x70] sm:$0xff] }
  0x40   :  { %v279_v40 = vpack.c.bf16 %v103_v35, %v102_v34  ;;  %v91_v46 = vld [vmem:[#allocation8 + $0x68] sm:$0xff]  ;;  %v106_v48 = vmul.f32 %v90_v45, %v74_v43  ;;  %v77_v51 = vld [vmem:[#allocation6 + $0x78] sm:$0xff]  ;;  %v92_v52 = vld [vmem:[#allocation8 + $0x70] sm:$0xff] }
  0x41   :  { %271 = vmatpush3.bf16.msra.mxu0 %v270_v19  ;;  %v282_v47 = vpack.c.bf16 %v105_v42, %v104_v41  ;;  %v107_v49 = vmul.f32 %v91_v46, %v75_v44  ;;  %v93_v53 = vld [vmem:[#allocation8 + $0x78] sm:$0xff]  ;;  %v108_v55 = vmul.f32 %v92_v52, %v76_v50 }
  0x42   :  { %272 = vmatprep.subr.bf16.mxu0 %v398_v0  ;;  %v109_v56 = vmul.f32 %v93_v53, %v77_v51  ;;  %v110_v58 = vld [vmem:[#allocation3] sm:$0xff] }
  0x43   :  { %v285_v54 = vpack.c.bf16 %v107_v49, %v106_v48  ;;  %v213_v59 = vld [vmem:[%s495_s3] ss:$0 sm:$0xff] }
  0x44   :  { %v288_v57 = vpack.c.bf16 %v109_v56, %v108_v55 }
  0x45   :  { %274 = vmatpush3.bf16.msra.mxu0 %v273_v26 }
  0x46   :  { %275 = vmatprep.subr.bf16.mxu0 %v398_v0 }
  0x49   :  { %277 = vmatpush3.bf16.msra.mxu0 %v276_v33 }
  0x4a   :  { %278 = vmatprep.subr.bf16.mxu0 %v398_v0 }
  0x4d   :  { %280 = vmatpush3.bf16.msra.mxu0 %v279_v40 }
  0x4e   :  { %281 = vmatprep.subr.bf16.mxu0 %v398_v0 }
  0x51   :  { %283 = vmatpush3.bf16.msra.mxu0 %v282_v47 }
  0x52   :  { %284 = vmatprep.subr.bf16.mxu0 %v398_v0 }
  0x55   :  { %286 = vmatpush3.bf16.msra.mxu0 %v285_v54 }
  0x56   :  { %287 = vmatprep.subr.bf16.mxu0 %v398_v0 }
  0x59   :  { %289 = vmatpush3.bf16.msra.mxu0 %v288_v57 }
  0x5c   :  { %264 = vmatmul.mubr.f32.vlgmr.msra.gmra.mrb[0].mxu0 %v110_v58 }
 0x12f   :  { %v178_v60 = vpop.f32.mrb[0].mxu0 }
 0x130   :  { %v195_v61 = vadd.f32 %v213_v59, %v178_v60  ;;  %v265_v62 = vpop.f32.mrb[1].mxu0 }
 0x132   :  { %196 = vst [vmem:[#allocation9] sm:$0xff] %v195_v61 }
 0x133   :  { %376 = shalt.err (!%p373_p0)
}
 0x134   :  { %s377_s5 = scalar_lea.hbm %s496_s4, 128 }
 0x135   :  { %p378_p1 = scmp.ne.s32.totalorder %s496_s4, %s377_s5  ;;  %p381_p2 = scmp.lt.u32.totalorder %s377_s5, %s496_s4 }
 0x137   :  { %p383_p3 = pnand %p381_p2, %p378_p1 }
 0x139   :  { %386 = shalt.err (!%p383_p3)
}
 0x13a   :  { %206 = dma.vmem_to_hbm [thread:$0]  %s204_s27, 128, %s496_s4, [#allocation5]  }
 0x13b   :  { %391 = dma.done.wait [#allocation5], 128  }
 0x13c   :  { %392 = vsyncadd [#allocation5], 4294967168 }
 0x13d   :  { %210 = vsyncpa [#allocation4], 1 }
 0x13e   :  { %211 = vsyncpa [#allocation7], 1 }
 0x13f   :  { %212 = vsyncpa [#allocation5], 1 }

</bundles_post_ra>
